<compile_context>
chip_gen: v7x
topology: tpu7x:2x2x1
jax: 0.10.0
libtpu: 0.0.40
codegen_flags: <defaults>
</compile_context>

<pallas_src>
import functools

import jax
import jax.numpy as jnp
from jax.experimental import pallas as pl
from jax.experimental.pallas import tpu as pltpu

EPS = 1e-6             # GeMP eps
GEM_P = 3.0            # GeMP p (learn_p=False -> compile-time constant)
MAX_LANE_TILE = 2048   # keeps the in-kernel lane-fold unroll <= 16


def _round_up(v, m):
    return ((v + m - 1) // m) * m


def _vmem_capacity_bytes():
    """Physical VMEM per TensorCore; conservative 64 MiB (v7x) fallback."""
    try:
        cap = getattr(pltpu.get_tpu_info(), "vmem_capacity_bytes", None)
        if cap:
            return int(cap)
    except Exception:
        pass
    return 64 << 20


def _choose_tiles(B, C, S, itemsize, budget, target_tile=16 << 20):
    """Pick (tb, ts, S_work).  Assumes B % 8 == 0.

    Strategy (per perf review): the spatial (lane) tile width is the main
    HBM-roofline lever for this streaming reduction, so it gets first claim on
    the budget (tb starts at its minimum and only grows with leftover budget);
    VMEM accounting is explicit (2x double-buffered input + f32 accumulator);
    when B is large enough the parallel batch axis keeps >= 2 grid steps so
    both v7x TensorCores get work.
    """

    def tile_bytes(tb, ts):
        return tb * C * ts * itemsize

    def acc_bytes(tb, ts):
        lanes = 128 if ts % 128 == 0 else ts
        return tb * C * lanes * 4

    def fits(tb, ts):
        total = 2 * tile_bytes(tb, ts) + acc_bytes(tb, ts) + 4 * C
        return tile_bytes(tb, ts) <= target_tile and total <= budget

    tb = 8

    if S <= MAX_LANE_TILE and fits(tb, S):
        # Whole spatial extent in one (possibly ragged) block: no padding and a
        # single reduction step.
        ts, S_work = S, S
    else:
        # Tile the spatial axis with a 128-multiple tile.  Start from the widest
        # tile the budget allows, then back off until padding S up to a multiple
        # of the tile wastes at most ~1/8 of the real data.
        ts_max = 128
        d = min(_round_up(S, 128), MAX_LANE_TILE)
        while d >= 128:
            if fits(tb, d):
                ts_max = d
                break
            d -= 128
        max_waste = max(S // 8, 127)
        ts = 128
        d = ts_max
        while d >= 128:
            if _round_up(S, d) - S <= max_waste:
                ts = d
                break
            d -= 128
        S_work = _round_up(S, ts)

    # Grow the batch tile with leftover budget (multiple of 8, must divide B),
    # capped so the parallel grid axis keeps >= 2 steps when B >= 16 (v7x).
    tb_cap = B if B < 16 else B // 2
    tb_cap = max(8, (tb_cap // 8) * 8)
    d = tb_cap
    while d > 8:
        if B % d == 0 and fits(d, ts):
            tb = d
            break
        d -= 8
    return tb, ts, S_work


def gem_head_kernel(x_ref, w_ref, b_ref, o_ref, acc_ref, *, inv_s, pad_corr, n_fold):
    """One (TB, C, tS) tile of GeM pooling + the 1-unit linear head.

    x_ref  : [TB, C, tS]  feature-map tile, native dtype (f32 or bf16)
    w_ref  : [1, C]       f32 head weight row (lane-dense)
    b_ref  : [1]          f32 head bias (SMEM)
    o_ref  : [TB, 1]      f32 logits (resident across the spatial grid axis)
    acc_ref: [TB, C, L]   f32 running sum of clamp(x, eps)^p; L = 128 when the
                          spatial tile folds (tS % 128 == 0), else L = tS.
    """
    k = pl.program_id(1)

    @pl.when(k == 0)
    def _init():
        acc_ref[...] = jnp.zeros_like(acc_ref)

    # Clamp in the native dtype (matches PyTorch, cheaper for bf16 inputs), cube
    # with VPU multiplies in f32 -- no EUP pow on the streaming tensor.
    x = jnp.maximum(x_ref[...], EPS).astype(jnp.float32)         # [TB, C, tS]
    xp = x * x * x

    # Per-step reduction stays pure VALU: fold 128-lane (vreg-aligned) slices of
    # the spatial axis into the lane-wide accumulator.  The single cross-lane
    # (XLU) reduce happens once, in finalize.
    if n_fold > 1:
        part = xp[:, :, 0:128]
        for j in range(1, n_fold):
            part = part + xp[:, :, j * 128:(j + 1) * 128]
    else:
        part = xp
    acc_ref[...] += part

    @pl.when(k == pl.num_programs(1) - 1)
    def _finalize():
        s = jnp.sum(acc_ref[...], axis=-1)                        # [TB, C]
        if pad_corr:
            s = s - pad_corr       # exact removal of eps^p pad contributions
        pooled = (s * inv_s) ** (1.0 / GEM_P)                     # GeM ^(1/p)
        # Linear(n_features, 1): broadcast-mul + lane reduce, no MXU needed.
        y = jnp.sum(pooled * w_ref[...], axis=-1, keepdims=True)  # [TB, 1]
        o_ref[...] = y + b_ref[0]


def block_attention_forward(x_nchw, w_head, b_head):
    """Wrapper: layout/padding glue in plain JAX, all compute in the kernel."""
    B, C, H, W = x_nchw.shape
    S = H * W
    x = x_nchw.reshape(B, C, S)                      # native dtype, no upcast
    w = w_head.reshape(1, C).astype(jnp.float32)
    b = b_head.reshape(1).astype(jnp.float32)

    # Generation-aware VMEM budget (v5e/v6e: 128 MiB, v7x: 64 MiB per core).
    cap = _vmem_capacity_bytes()
    vmem_limit = min(int(cap * 0.9), 96 << 20)
    budget = int(vmem_limit * 0.8)

    # Pad batch to a multiple of 8 (sublane rule for the (tb, 1) output block);
    # extra rows compute harmless garbage and are sliced off afterwards.
    B_pad = _round_up(B, 8)
    if B_pad != B:
        x = jnp.pad(x, ((0, B_pad - B), (0, 0), (0, 0)))

    tb, ts, S_work = _choose_tiles(B_pad, C, S, x.dtype.itemsize, budget)
    if S_work != S:
        # Pad spatial to a multiple of the tile; each pad element contributes
        # exactly eps^p after the clamp, subtracted analytically in the kernel.
        x = jnp.pad(x, ((0, 0), (0, 0), (0, S_work - S)))

    n_fold = ts // 128 if ts % 128 == 0 else 1
    acc_lanes = 128 if ts % 128 == 0 else ts
    grid = (B_pad // tb, S_work // ts)

    kernel = functools.partial(
        gem_head_kernel,
        inv_s=1.0 / float(S),
        pad_corr=float(S_work - S) * (EPS ** GEM_P),
        n_fold=n_fold,
    )

    out = pl.pallas_call(
        kernel,
        out_shape=jax.ShapeDtypeStruct((B_pad, 1), jnp.float32),
        grid_spec=pltpu.PrefetchScalarGridSpec(
            num_scalar_prefetch=0,
            grid=grid,
            in_specs=[
                pl.BlockSpec((tb, C, ts), lambda i, k: (i, 0, k)),
                pl.BlockSpec((1, C), lambda i, k: (0, 0)),
                pl.BlockSpec(memory_space=pltpu.MemorySpace.SMEM),
            ],
            out_specs=pl.BlockSpec((tb, 1), lambda i, k: (i, 0)),
            scratch_shapes=[pltpu.VMEM((tb, C, acc_lanes), jnp.float32)],
        ),
        compiler_params=pltpu.CompilerParams(
            dimension_semantics=("parallel", "arbitrary"),
            vmem_limit_bytes=vmem_limit,
        ),
    )(x, w, b)
    return out[:B]


def reference_forward(x_nchw, w_head, b_head):
    """Plain-JAX reference mirroring the PyTorch forward."""
    x = jnp.maximum(x_nchw.astype(jnp.float32), EPS) ** GEM_P
    x = jnp.mean(x, axis=(-2, -1)) ** (1.0 / GEM_P)          # GeM pool -> [B, C]
    return x @ w_head.T.astype(jnp.float32) + b_head.astype(jnp.float32)


if __name__ == "__main__":
    key = jax.random.PRNGKey(0)
    kx, kw, kb = jax.random.split(key, 3)

    B, C, H, W = 2, 4, 16, 16                 # n_features = C = 4
    x = jax.random.normal(kx, (B, C, H, W), dtype=jnp.float32)
    # Deterministic head params (nn.Linear(n_features, 1)): weight [1, C], bias [1]
    w_head = jax.random.normal(kw, (1, C), dtype=jnp.float32) * 0.1
    b_head = jax.random.normal(kb, (1,), dtype=jnp.float32) * 0.01

    out = jax.block_until_ready(block_attention_forward(x, w_head, b_head))
    ref = reference_forward(x, w_head, b_head)

    assert out.shape == (B, 1)
    assert jnp.allclose(out, ref, atol=1e-5, rtol=1e-5), (out, ref)
    print("KERNEL_OK")
</pallas_src>

<mosaic_0001>
module attributes {stable_mosaic.version = 11 : i64} {
  func.func @gem_head_kernel(%arg0: i32, %arg1: i32, %arg2: memref<8x4x256xf32, #tpu.memory_space<vmem>>, %arg3: memref<1x4xf32, #tpu.memory_space<vmem>>, %arg4: memref<1xf32, #tpu.memory_space<smem>>, %arg5: memref<8x1xf32, #tpu.memory_space<vmem>>, %arg6: memref<8x4x128xf32, #tpu.memory_space<vmem>>) attributes {dimension_semantics = [#tpu.dimension_semantics<parallel>, #tpu.dimension_semantics<arbitrary>], iteration_bounds = array<i64: 1, 1>, scalar_prefetch = 0 : i64, scratch_operands = 1 : i64, tpu.core_type = #tpu.core_type<tc>, window_params = [{transform_indices = @transform_0, window_bounds = array<i64: 8, 4, 256>}, {pipeline_mode = #tpu.pipeline_mode<synchronous>, transform_indices = @transform_1, window_bounds = array<i64: 1, 4>}, {transform_indices = @transform_2, window_bounds = array<i64: 1>}, {transform_indices = @transform_3, window_bounds = array<i64: 8, 1>}]} {
    %c0_i32 = arith.constant 0 : i32
    %0 = arith.cmpi eq, %arg1, %c0_i32 : i32
    %1 = arith.extui %0 : i1 to i32
    %c0_i32_0 = arith.constant 0 : i32
    %2 = arith.cmpi ne, %1, %c0_i32_0 : i32
    scf.if %2 {
      %cst_11 = arith.constant 0.000000e+00 : f32
      %17 = vector.broadcast %cst_11 : f32 to vector<8x4x128xf32>
      %c0_12 = arith.constant 0 : index
      %c0_13 = arith.constant 0 : index
      %c0_14 = arith.constant 0 : index
      %18 = vector.load %arg6[%c0_12, %c0_13, %c0_14] : memref<8x4x128xf32, #tpu.memory_space<vmem>>, vector<8x4x128xf32>
      tpu.vector_store %arg6[%c0_12, %c0_13, %c0_14], %17 {strides = array<i32>} : memref<8x4x128xf32, #tpu.memory_space<vmem>>, vector<8x4x128xf32>,
    } else {
    }
    %c0 = arith.constant 0 : index
    %c0_1 = arith.constant 0 : index
    %c0_2 = arith.constant 0 : index
    %3 = vector.load %arg2[%c0, %c0_1, %c0_2] : memref<8x4x256xf32, #tpu.memory_space<vmem>>, vector<8x4x256xf32>
    %cst = arith.constant 9.99999997E-7 : f32
    %4 = vector.broadcast %cst : f32 to vector<8x4x256xf32>
    %5 = arith.maximumf %3, %4 : vector<8x4x256xf32>
    %6 = arith.mulf %5, %5 : vector<8x4x256xf32>
    %7 = arith.mulf %6, %5 : vector<8x4x256xf32>
    %8 = vector.extract_strided_slice %7 {offsets = [0, 0, 0], sizes = [8, 4, 128], strides = [1, 1, 1]} : vector<8x4x256xf32> to vector<8x4x128xf32>
    %9 = vector.extract_strided_slice %7 {offsets = [0, 0, 128], sizes = [8, 4, 128], strides = [1, 1, 1]} : vector<8x4x256xf32> to vector<8x4x128xf32>
    %10 = arith.addf %8, %9 : vector<8x4x128xf32>
    %c0_3 = arith.constant 0 : index
    %c0_4 = arith.constant 0 : index
    %c0_5 = arith.constant 0 : index
    %11 = vector.load %arg6[%c0_3, %c0_4, %c0_5] : memref<8x4x128xf32, #tpu.memory_space<vmem>>, vector<8x4x128xf32>
    %12 = arith.addf %11, %10 : vector<8x4x128xf32>
    %c0_6 = arith.constant 0 : index
    %c0_7 = arith.constant 0 : index
    %c0_8 = arith.constant 0 : index
    %13 = vector.load %arg6[%c0_6, %c0_7, %c0_8] : memref<8x4x128xf32, #tpu.memory_space<vmem>>, vector<8x4x128xf32>
    tpu.vector_store %arg6[%c0_6, %c0_7, %c0_8], %12 {strides = array<i32>} : memref<8x4x128xf32, #tpu.memory_space<vmem>>, vector<8x4x128xf32>,
    %c0_i32_9 = arith.constant 0 : i32
    %14 = arith.cmpi eq, %arg1, %c0_i32_9 : i32
    %15 = arith.extui %14 : i1 to i32
    %c0_i32_10 = arith.constant 0 : i32
    %16 = arith.cmpi ne, %15, %c0_i32_10 : i32
    scf.if %16 {
      %c0_11 = arith.constant 0 : index
      %c0_12 = arith.constant 0 : index
      %c0_13 = arith.constant 0 : index
      %17 = vector.load %arg6[%c0_11, %c0_12, %c0_13] : memref<8x4x128xf32, #tpu.memory_space<vmem>>, vector<8x4x128xf32>
      %cst_14 = arith.constant dense<0.000000e+00> : vector<8x4xf32>
      %18 = vector.multi_reduction <add>, %17, %cst_14 [2] : vector<8x4x128xf32> to vector<8x4xf32>
      %cst_15 = arith.constant 3.906250e-03 : f32
      %19 = vector.broadcast %cst_15 : f32 to vector<8x4xf32>
      %20 = arith.mulf %18, %19 : vector<8x4xf32>
      %cst_16 = arith.constant 0.333333343 : f32
      %21 = vector.broadcast %cst_16 : f32 to vector<8x4xf32>
      %22 = math.powf %20, %21 : vector<8x4xf32>
      %c0_17 = arith.constant 0 : index
      %c0_18 = arith.constant 0 : index
      %23 = vector.load %arg3[%c0_17, %c0_18] : memref<1x4xf32, #tpu.memory_space<vmem>>, vector<1x4xf32>
      %24 = vector.broadcast %23 : vector<1x4xf32> to vector<8x4xf32>
      %25 = arith.mulf %22, %24 : vector<8x4xf32>
      %cst_19 = arith.constant dense<0.000000e+00> : vector<8xf32>
      %26 = vector.multi_reduction <add>, %25, %cst_19 [1] : vector<8x4xf32> to vector<8xf32>
      %27 = vector.shape_cast %26 : vector<8xf32> to vector<8x1xf32>
      %c0_20 = arith.constant 0 : index
      %28 = memref.load %arg4[%c0_20] : memref<1xf32, #tpu.memory_space<smem>>
      %29 = vector.broadcast %28 : f32 to vector<8x1xf32>
      %30 = arith.addf %27, %29 : vector<8x1xf32>
      %c0_21 = arith.constant 0 : index
      %c0_22 = arith.constant 0 : index
      %31 = vector.load %arg5[%c0_21, %c0_22] : memref<8x1xf32, #tpu.memory_space<vmem>>, vector<8x1xf32>
      tpu.vector_store %arg5[%c0_21, %c0_22], %30 {strides = array<i32>} : memref<8x1xf32, #tpu.memory_space<vmem>>, vector<8x1xf32>,
    } else {
    }
    return
  }
  func.func @transform_0(%arg0: i32, %arg1: i32) -> (i32, i32, i32) {
    %c0_i32 = arith.constant 0 : i32
    %c0_i32_0 = arith.constant 0 : i32
    return %arg0, %c0_i32, %arg1 : i32, i32, i32
  }
  func.func @transform_1(%arg0: i32, %arg1: i32) -> (i32, i32) {
    %c0_i32 = arith.constant 0 : i32
    %c0_i32_0 = arith.constant 0 : i32
    %c0_i32_1 = arith.constant 0 : i32
    return %c0_i32, %c0_i32_0 : i32, i32
  }
  func.func @transform_2(%arg0: i32, %arg1: i32) -> i32 {
    %c0_i32 = arith.constant 0 : i32
    %c0_i32_0 = arith.constant 0 : i32
    return %c0_i32 : i32
  }
  func.func @transform_3(%arg0: i32, %arg1: i32) -> (i32, i32) {
    %c0_i32 = arith.constant 0 : i32
    %c0_i32_0 = arith.constant 0 : i32
    return %arg0, %c0_i32 : i32, i32
  }
}

</mosaic_0001>

<bundles_post_ra>
// kernel: tpu_custom_call.1
= control target key start
LH: loop header
LB: loop body
LE: loop exit
PB: predicated region body
PF: predicated region fallthrough
CT: control target
= control target key end

     0   :  { %9 = vsyncpa [#allocation5], 0  ;;  %s502_s12 = smov [#allocation4]   ;;  %s716_s0 = inlined_call_operand.hbm [shape: f32[8,4,256], index: 0, kind: input, shape index: {}]   ;;  %s717_s1 = inlined_call_operand.vmem [shape: f32[1,4], index: 1, kind: input, shape index: {}]   ;;  %s718_s2 = inlined_call_operand.<no memory space> [shape: f32[1], index: 2, kind: input, shape index: {}]   ;;  %s719_s3 = inlined_call_operand.vmem [shape: f32[8,1], index: 3, kind: output, shape index: {}]  }
   0x1   :  { %s15_s13 = sshll.u32 %s502_s12, 4  ;;  %s478_s16 = scalar_lea.hbm %s716_s0, 1024  ;;  %s16_s13 = int_to_ptr.vmem [resolvable:$true] %s15_s13 }
   0x2   :  { %p479_p0 = scmp.ne.s32.totalorder %s716_s0, %s478_s16  ;;  %p482_p1 = scmp.lt.u32.totalorder %s478_s16, %s716_s0 }
   0x4   :  { %p484_p2 = pnand %p482_p1, %p479_p0 }
   0x6   :  { %487 = shalt.err (!%p484_p2)
}
   0x7   :  { %s488_s21 = scalar_lea.vmem %s16_s13, 1024  ;;  %p493_p4 = scmp.lt.s32.totalorder %s16_s13, %s16_s13 }
   0x8   :  { %p489_p3 = scmp.ne.s32.totalorder %s16_s13, %s488_s21  ;;  %p494_p5 = scmp.lt.s32.totalorder %s488_s21, %s488_s21 }
   0xa   :  { %p495_p6 = por %p494_p5, %p493_p4 }
   0xc   :  { %p496_p7 = pnand %p495_p6, %p489_p3 }
   0xe   :  { %499 = shalt.err (!%p496_p7)
}
   0xf   :  { %s503_s22 = smov 128   ;;  %s504_s23 = smov 8  }
  0x10   :  { %21 = dma.hbm_to_vmem [thread:$0]  %s716_s0, 1024, %s16_s13, [#allocation5], %s503_s22, %s503_s22, %s504_s23  }
  0x11   :  { %500 = dma.done.wait [#allocation5], 1024  }
  0x12   :  { %501 = vsyncadd [#allocation5], 4294966272  ;;  %v505_v0 = vmov 0.0   ;;  %v43_v1 = vld [vmem:[#allocation4 + $0x10] sm:$0xff]  ;;  %v41_v2 = vld [vmem:[#allocation4] sm:$0xff]  ;;  %vm140_vm0 = vcmask 1043456  }
  0x13   :  { %35 = vst [vmem:[#allocation2 + $0x8] sm:$0xf] %v505_v0  ;;  %33 = vst [vmem:[#allocation2] sm:$0xf] %v505_v0  ;;  %v44_v3 = vld [vmem:[#allocation4 + $0x18] sm:$0xff]  ;;  %v42_v9 = vld [vmem:[#allocation4 + $0x8] sm:$0xff] }
  0x14   :  { %34 = vst [vmem:[#allocation2 + $0x4] sm:$0xf] %v505_v0  ;;  %36 = vst [vmem:[#allocation2 + $0xc] sm:$0xf] %v505_v0  ;;  %v51_v4 = vmax.f32 %v43_v1, 1e-06 }
  0x15   :  { %37 = vst [vmem:[#allocation2 + $0x10] sm:$0xf] %v505_v0  ;;  %38 = vst [vmem:[#allocation2 + $0x14] sm:$0xf] %v505_v0  ;;  %v49_v5 = vmax.f32 %v41_v2, 1e-06 }
  0x16   :  { %39 = vst [vmem:[#allocation2 + $0x18] sm:$0xf] %v505_v0  ;;  %40 = vst [vmem:[#allocation2 + $0x1c] sm:$0xf] %v505_v0  ;;  %v52_v6 = vmax.f32 %v44_v3, 1e-06  ;;  %v59_v7 = vmul.f32 %v51_v4, %v51_v4 }
  0x17   :  { %v57_v8 = vmul.f32 %v49_v5, %v49_v5  ;;  %v46_v10 = vld [vmem:[#allocation4 + $0x28] sm:$0xff]  ;;  %v50_v12 = vmax.f32 %v42_v9, 1e-06  ;;  %v45_v16 = vld [vmem:[#allocation4 + $0x20] sm:$0xff]  ;;  %v48_v17 = vld [vmem:[#allocation4 + $0x38] sm:$0xff] }
  0x18   :  { %v60_v11 = vmul.f32 %v52_v6, %v52_v6  ;;  %v54_v13 = vmax.f32 %v46_v10, 1e-06  ;;  %v67_v14 = vmul.f32 %v59_v7, %v51_v4  ;;  %v53_v21 = vmax.f32 %v45_v16, 1e-06  ;;  %v47_v22 = vld [vmem:[#allocation4 + $0x30] sm:$0xff] }
  0x19   :  { %v65_v15 = vmul.f32 %v57_v8, %v49_v5  ;;  %v58_v19 = vmul.f32 %v50_v12, %v50_v12  ;;  %v56_v25 = vmax.f32 %v48_v17, 1e-06  ;;  %v55_v26 = vmax.f32 %v47_v22, 1e-06  ;;  %v294_v17 = vld [vmem:[%s717_s1] ss:$0 sm:$0xff] }
  0x1a   :  { %v68_v18 = vmul.f32 %v60_v11, %v52_v6  ;;  %v62_v20 = vmul.f32 %v54_v13, %v54_v13  ;;  %v83_v23 = vrot.slane %v67_v14, 4  ;;  %v107_v27 = vld [vmem:[#allocation2 + $0x8] sm:$0xf]  ;;  %v105_v28 = vld [vmem:[#allocation2] sm:$0xf]  ;;  %v61_v32 = vmul.f32 %v53_v21, %v53_v21 }
  0x1b   :  { %v81_v24 = vrot.slane %v65_v15, 4  ;;  %v66_v30 = vmul.f32 %v58_v19, %v50_v12  ;;  %v108_v35 = vld [vmem:[#allocation2 + $0xc] sm:$0xf]  ;;  %v64_v36 = vmul.f32 %v56_v25, %v56_v25  ;;  %v63_v37 = vmul.f32 %v55_v26, %v55_v26  ;;  %v106_v44 = vld [vmem:[#allocation2 + $0x4] sm:$0xf] }
  0x1c   :  { %v84_v29 = vrot.slane %v68_v18, 4  ;;  %v70_v31 = vmul.f32 %v62_v20, %v54_v13  ;;  %v99_v33 = vadd.f32 %v83_v23, %v67_v14  ;;  %v69_v41 = vmul.f32 %v61_v32, %v53_v21  ;;  %v110_v45 = vld [vmem:[#allocation2 + $0x14] sm:$0xf]  ;;  %v109_v52 = vld [vmem:[#allocation2 + $0x10] sm:$0xf] }
  0x1d   :  { %v97_v34 = vadd.f32 %v81_v24, %v65_v15  ;;  %v82_v39 = vrot.slane %v66_v30, 4  ;;  %v72_v46 = vmul.f32 %v64_v36, %v56_v25  ;;  %v71_v47 = vmul.f32 %v63_v37, %v55_v26  ;;  %v112_v58 = vld [vmem:[#allocation2 + $0x1c] sm:$0xf]  ;;  %v111_v59 = vld [vmem:[#allocation2 + $0x18] sm:$0xf] }
  0x1e   :  { %v100_v38 = vadd.f32 %v84_v29, %v68_v18  ;;  %v86_v40 = vrot.slane %v70_v31, 4  ;;  %v115_v42 = vadd.f32 %v107_v27, %v99_v33  ;;  %v85_v51 = vrot.slane %v69_v41, 4 }
  0x1f   :  { %v113_v43 = vadd.f32 %v105_v28, %v97_v34  ;;  %v98_v49 = vadd.f32 %v82_v39, %v66_v30  ;;  %v88_v53 = vrot.slane %v72_v46, 4  ;;  %v87_v54 = vrot.slane %v71_v47, 4 }
  0x20   :  { %v116_v48 = vadd.f32 %v108_v35, %v100_v38  ;;  %v102_v50 = vadd.f32 %v86_v40, %v70_v31  ;;  %123 = vst [vmem:[#allocation2 + $0x8] sm:$0xf] %v115_v42  ;;  %v101_v57 = vadd.f32 %v85_v51, %v69_v41  ;;  %v506_v18 = vmov 0  }
  0x21   :  { %121 = vst [vmem:[#allocation2] sm:$0xf] %v113_v43  ;;  %v114_v55 = vadd.f32 %v106_v44, %v98_v49  ;;  %v104_v60 = vadd.f32 %v88_v53, %v72_v46  ;;  %v103_v61 = vadd.f32 %v87_v54, %v71_v47  ;;  %444 = vset.pattern.permute.xlu1 %v506_v18 }
  0x22   :  { %124 = vst [vmem:[#allocation2 + $0xc] sm:$0xf] %v116_v48  ;;  %v118_v56 = vadd.f32 %v110_v45, %v102_v50  ;;  %v117_v62 = vadd.f32 %v109_v52, %v101_v57  ;;  %445 = vset.pattern.permute.xlu0 %v506_v18 }
  0x23   :  { %122 = vst [vmem:[#allocation2 + $0x4] sm:$0xf] %v114_v55  ;;  %v120_v63 = vadd.f32 %v112_v58, %v104_v60  ;;  %v119_v0 = vadd.f32 %v111_v59, %v103_v61 }
  0x24   :  { %126 = vst [vmem:[#allocation2 + $0x14] sm:$0xf] %v118_v56  ;;  %125 = vst [vmem:[#allocation2 + $0x10] sm:$0xf] %v117_v62 }
  0x25   :  { %128 = vst [vmem:[#allocation2 + $0x1c] sm:$0xf] %v120_v63  ;;  %127 = vst [vmem:[#allocation2 + $0x18] sm:$0xf] %v119_v0 }
  0x27   :  { %v134_v1 = vld [vmem:[#allocation2 + $0x8] sm:$0xf] }
  0x28   :  { %v132_v2 = vld [vmem:[#allocation2] sm:$0xf]  ;;  %v147_v3 = vsel %vm140_vm0, %v134_v1, 0.0 }
  0x29   :  { %v141_v4 = vsel %vm140_vm0, %v132_v2, 0.0  ;;  %v135_v5 = vld [vmem:[#allocation2 + $0xc] sm:$0xf]  ;;  %148 = vadd.xlane.f32.xlu1 %v147_v3 }
  0x2a   :  { %142 = vadd.xlane.f32.xlu0 %v141_v4  ;;  %v150_v6 = vsel %vm140_vm0, %v135_v5, 0.0  ;;  %v133_v7 = vld [vmem:[#allocation2 + $0x4] sm:$0xf] }
  0x2b   :  { %v144_v8 = vsel %vm140_vm0, %v133_v7, 0.0  ;;  %v137_v9 = vld [vmem:[#allocation2 + $0x14] sm:$0xf]  ;;  %v136_v10 = vld [vmem:[#allocation2 + $0x10] sm:$0xf] }
  0x2c   :  { %v156_v11 = vsel %vm140_vm0, %v137_v9, 0.0  ;;  %v153_v12 = vsel %vm140_vm0, %v136_v10, 0.0  ;;  %v139_v13 = vld [vmem:[#allocation2 + $0x1c] sm:$0xf]  ;;  %v138_v14 = vld [vmem:[#allocation2 + $0x18] sm:$0xf] }
  0x2d   :  { %151 = vadd.xlane.f32.xlu1 %v150_v6  ;;  %v162_v15 = vsel %vm140_vm0, %v139_v13, 0.0  ;;  %v159_v16 = vsel %vm140_vm0, %v138_v14, 0.0 }
  0x2e   :  { %145 = vadd.xlane.f32.xlu0 %v144_v8 }
  0x31   :  { %157 = vadd.xlane.f32.xlu1 %v156_v11 }
  0x32   :  { %154 = vadd.xlane.f32.xlu0 %v153_v12 }
  0x35   :  { %163 = vadd.xlane.f32.xlu1 %v162_v15 }
  0x36   :  { %160 = vadd.xlane.f32.xlu0 %v159_v16 }
  0x4c   :  { %188 = vbcast.lane.b32.xlu0 %v294_v17, 256 }
  0xb6   :  { %v149_v19 = vpop.xlane.xlu1 %148 }
  0xb7   :  { %v143_v20 = vpop.xlane.xlu0 %142  ;;  %v550_v21 = vmul.f32 0.00390625, %v149_v19 }
  0xb8   :  { %v552_v22 = vmul.f32 0.00390625, %v143_v20 }
  0xb9   :  { %v555_v23 = vand.u32 2147483647, %v550_v21  ;;  %vm332_vm5 = vcmp.lt.f32.partialorder %v550_v21, 0.0  ;;  %v337_v57 = vand.u32 2147483648, %v550_v21 }
  0xba   :  { %v558_v24 = vand.u32 2147483647, %v552_v22  ;;  %v152_v25 = vpop.xlane.xlu1 %151  ;;  %vm295_vm1 = vcmp.eq.f32.partialorder %v552_v22, 0.0  ;;  %vm296_vm2 = vcmp.lt.f32.partialorder %v552_v22, 0.0  ;;  %v301_v55 = vand.u32 2147483648, %v552_v22 }
  0xbb   :  { %v146_v26 = vpop.xlane.xlu0 %145  ;;  %446 = vlog2.f32 %v555_v23  ;;  %v561_v27 = vmul.f32 0.00390625, %v152_v25  ;;  %vm341_vm15 = vweird.f32 %v555_v23  ;;  %vm343_vm13 = vcmp.eq.f32.partialorder %v555_v23, 0.0 }
  0xbc   :  { %v563_v28 = vmul.f32 0.00390625, %v146_v26  ;;  %448 = vlog2.f32 %v558_v24  ;;  %vm298_vm3 = vcmp.eq.f32.partialorder %v558_v24, inf  ;;  %vm305_vm4 = vweird.f32 %v558_v24 }
  0xbd   :  { %v567_v29 = vand.u32 2147483647, %v561_v27  ;;  %vm307_vm6 = vcmp.eq.f32.partialorder %v558_v24, 0.0  ;;  %vm350_vm7 = vcmp.lt.f32.partialorder %v561_v27, 0.0  ;;  %v355_v60 = vand.u32 2147483648, %v561_v27 }
  0xbe   :  { %v570_v30 = vand.u32 2147483647, %v563_v28  ;;  %v158_v31 = vpop.xlane.xlu1 %157  ;;  %v319_v62 = vand.u32 2147483648, %v563_v28  ;;  %vm334_vm0 = vcmp.eq.f32.partialorder %v555_v23, inf }
  0xbf   :  { %v155_v32 = vpop.xlane.xlu0 %154  ;;  %450 = vlog2.f32 %v567_v29  ;;  %v573_v33 = vmul.f32 0.00390625, %v158_v31  ;;  %vm359_vm9 = vweird.f32 %v567_v29  ;;  %vm361_vm12 = vcmp.eq.f32.partialorder %v567_v29, 0.0 }
  0xc0   :  { %v575_v34 = vmul.f32 0.00390625, %v155_v32  ;;  %452 = vlog2.f32 %v570_v30  ;;  %vm323_vm10 = vweird.f32 %v570_v30  ;;  %vm325_vm11 = vcmp.eq.f32.partialorder %v570_v30, 0.0 }
  0xc1   :  { %v579_v35 = vand.u32 2147483647, %v573_v33  ;;  %v391_v16 = vand.u32 2147483648, %v573_v33 }
  0xc2   :  { %v582_v36 = vand.u32 2147483647, %v575_v34  ;;  %v164_v37 = vpop.xlane.xlu1 %163  ;;  %v373_v6 = vand.u32 2147483648, %v575_v34 }
  0xc3   :  { %v161_v38 = vpop.xlane.xlu0 %160  ;;  %454 = vlog2.f32 %v579_v35  ;;  %v585_v39 = vmul.f32 0.00390625, %v164_v37 }
  0xc4   :  { %v587_v40 = vmul.f32 0.00390625, %v161_v38  ;;  %456 = vlog2.f32 %v582_v36  ;;  %vm377_vm14 = vweird.f32 %v582_v36  ;;  %vm379_vm8 = vcmp.eq.f32.partialorder %v582_v36, 0.0 }
  0xc5   :  { %v447_v41 = vpop.eup %446  ;;  %v591_v42 = vand.u32 2147483647, %v585_v39 }
  0xc6   :  { %v449_v43 = vpop.eup %448  ;;  %v338_v44 = vmul.f32 0.33333334, %v447_v41  ;;  %v594_v45 = vand.u32 2147483647, %v587_v40 }
  0xc7   :  { %v302_v46 = vmul.f32 0.33333334, %v449_v43  ;;  %458 = vlog2.f32 %v591_v42  ;;  %v630_v11 = vpop.permute.xlu0 %188  ;;  %v427_v43 = vand.u32 2147483648, %v585_v39 }
  0xc8   :  { %460 = vpow2.f32 %v338_v44 }
  0xc9   :  { %v451_v47 = vpop.eup %450  ;;  %462 = vpow2.f32 %v302_v46 }
  0xca   :  { %v453_v48 = vpop.eup %452  ;;  %v356_v49 = vmul.f32 0.33333334, %v451_v47  ;;  %464 = vlog2.f32 %v594_v45 }
  0xcb   :  { %v320_v50 = vmul.f32 0.33333334, %v453_v48 }
  0xcc   :  { %466 = vpow2.f32 %v356_v49 }
  0xcd   :  { %v455_v51 = vpop.eup %454  ;;  %468 = vpow2.f32 %v320_v50 }
  0xce   :  { %v457_v52 = vpop.eup %456  ;;  %v392_v53 = vmul.f32 0.33333334, %v455_v51 }
  0xcf   :  { %v374_v54 = vmul.f32 0.33333334, %v457_v52 }
  0xd0   :  { %470 = vpow2.f32 %v392_v53 }
  0xd1   :  { %v459_v56 = vpop.eup %458  ;;  %472 = vpow2.f32 %v374_v54 }
  0xd2   :  { %v461_v58 = vpop.eup %460  ;;  %v428_v59 = vmul.f32 0.33333334, %v459_v56 }
  0xd3   :  { %v463_v61 = vpop.eup %462  ;;  %v340_v63 = vor.u32 %v461_v58, %v337_v57 }
  0xd4   :  { %v465_v0 = vpop.eup %464  ;;  %474 = vpow2.f32 %v428_v59  ;;  %v304_v1 = vor.u32 %v463_v61, %v301_v55 }
  0xd5   :  { %v410_v2 = vmul.f32 0.33333334, %v465_v0  ;;  %v342_v3 = vsel %vm341_vm15, %v550_v21, %v340_v63  ;;  %vm368_vm15 = vcmp.lt.f32.partialorder %v575_v34, 0.0 }
  0xd6   :  { %v467_v4 = vpop.eup %466  ;;  %v306_v5 = vsel %vm305_vm4, %v552_v22, %v304_v1  ;;  %v345_v10 = vsel %vm343_vm13, %v337_v57, %v342_v3  ;;  %vm367_vm4 = vcmp.eq.f32.partialorder %v575_v34, 0.0  ;;  %vm413_vm13 = vweird.f32 %v594_v45 }
  0xd7   :  { %v469_v7 = vpop.eup %468  ;;  %476 = vpow2.f32 %v410_v2  ;;  %v309_v8 = vsel %vm307_vm6, %v301_v55, %v306_v5  ;;  %v358_v9 = vor.u32 %v467_v4, %v355_v60  ;;  %vm395_vm6 = vweird.f32 %v579_v35 }
  0xd8   :  { %v310_v12 = vsel %vm296_vm2, nan, %v309_v8  ;;  %v322_v13 = vor.u32 %v469_v7, %v319_v62  ;;  %v346_v22 = vsel %vm332_vm5, nan, %v345_v10  ;;  %vm721_vm2 = vcmp.lt.f32.partialorder %v563_v28, 0.0 }
  0xd9   :  { %v311_v14 = vsel %vm295_vm1, 0.0, %v310_v12  ;;  %v360_v15 = vsel %vm359_vm9, %v561_v27, %v358_v9  ;;  %vm720_vm1 = vcmp.eq.f32.partialorder %v561_v27, 0.0  ;;  %vm723_vm5 = vcmp.eq.f32.partialorder %v563_v28, 0.0 }
  0xda   :  { %v471_v17 = vpop.eup %470  ;;  %v312_v18 = vsel %vm298_vm3, inf, %v311_v14  ;;  %v363_v19 = vsel %vm361_vm12, %v355_v60, %v360_v15  ;;  %v324_v20 = vsel %vm323_vm10, %v563_v28, %v322_v13  ;;  %vm722_vm3 = vcmp.eq.f32.partialorder %v567_v29, inf }
  0xdb   :  { %v473_v25 = vpop.eup %472  ;;  %v191_v26 = vmul.f32 %v312_v18, %v630_v11  ;;  %v364_v31 = vsel %vm350_vm7, nan, %v363_v19  ;;  %v327_v24 = vsel %vm325_vm11, %v319_v62, %v324_v20  ;;  %v394_v32 = vor.u32 %v471_v17, %v391_v16 }
  0xdc   :  { %v365_v37 = vsel %vm720_vm1, 0.0, %v364_v31  ;;  %v328_v38 = vsel %vm721_vm2, nan, %v327_v24  ;;  %v376_v41 = vor.u32 %v473_v25, %v373_v6  ;;  %vm724_vm7 = vcmp.eq.f32.partialorder %v550_v21, 0.0 }
  0xdd   :  { %208 = vperm.xlu1 %444, %v191_v26   ;;  %v366_v44 = vsel %vm722_vm3, inf, %v365_v37  ;;  %v329_v46 = vsel %vm723_vm5, 0.0, %v328_v38  ;;  %v347_v47 = vsel %vm724_vm7, 0.0, %v346_v22  ;;  %v396_v27 = vsel %vm395_vm6, %v573_v33, %v394_v32 }
  0xde   :  { %v475_v48 = vpop.eup %474  ;;  %v194_v49 = vmul.f32 %v366_v44, %v630_v11  ;;  %vm725_vm9 = vcmp.eq.f32.partialorder %v570_v30, inf  ;;  %v378_v29 = vsel %vm377_vm14, %v575_v34, %v376_v41  ;;  %vm397_vm10 = vcmp.eq.f32.partialorder %v579_v35, 0.0 }
  0xdf   :  { %v330_v50 = vsel %vm725_vm9, inf, %v329_v46  ;;  %v381_v21 = vsel %vm379_vm8, %v373_v6, %v378_v29  ;;  %v399_v51 = vsel %vm397_vm10, %v391_v16, %v396_v27  ;;  %v430_v52 = vor.u32 %v475_v48, %v427_v43 }
  0xe0   :  { %v192_v28 = vmul.f32 %v330_v50, %v630_v11  ;;  %217 = vperm.xlu0 %445, %v194_v49   ;;  %v348_v53 = vsel %vm334_vm0, inf, %v347_v47  ;;  %v409_v30 = vand.u32 2147483648, %v587_v40  ;;  %v382_v54 = vsel %vm368_vm15, nan, %v381_v21 }
  0xe1   :  { %vm431_vm11 = vweird.f32 %v591_v42  ;;  %v477_v55 = vpop.eup %476  ;;  %v383_v56 = vsel %vm367_vm4, 0.0, %v382_v54  ;;  %vm386_vm8 = vcmp.lt.f32.partialorder %v573_v33, 0.0  ;;  %vm433_vm12 = vcmp.eq.f32.partialorder %v591_v42, 0.0 }
  0xe2   :  { %211 = vperm.xlu1 %444, %v192_v28   ;;  %v432_v57 = vsel %vm431_vm11, %v585_v39, %v430_v52  ;;  %v412_v58 = vor.u32 %v477_v55, %v409_v30  ;;  %v400_v59 = vsel %vm386_vm8, nan, %v399_v51  ;;  %v193_v23 = vmul.f32 %v348_v53, %v630_v11 }
  0xe3   :  { %vm370_vm14 = vcmp.eq.f32.partialorder %v582_v36, inf  ;;  %v435_v60 = vsel %vm433_vm12, %v427_v43, %v432_v57  ;;  %vm415_vm0 = vcmp.eq.f32.partialorder %v594_v45, 0.0  ;;  %vm385_vm15 = vcmp.eq.f32.partialorder %v573_v33, 0.0 }
  0xe4   :  { %v414_v61 = vsel %vm413_vm13, %v587_v40, %v412_v58  ;;  %v384_v34 = vsel %vm370_vm14, inf, %v383_v56  ;;  %vm404_vm4 = vcmp.lt.f32.partialorder %v587_v40, 0.0  ;;  %v401_v63 = vsel %vm385_vm15, 0.0, %v400_v59 }
  0xe5   :  { %v417_v62 = vsel %vm415_vm0, %v409_v30, %v414_v61  ;;  %vm422_vm6 = vcmp.lt.f32.partialorder %v585_v39, 0.0  ;;  %vm403_vm1 = vcmp.eq.f32.partialorder %v587_v40, 0.0  ;;  %vm406_vm2 = vcmp.eq.f32.partialorder %v594_v45, inf }
  0xe6   :  { %214 = vperm.xlu1 %444, %v193_v23   ;;  %v418_v0 = vsel %vm404_vm4, nan, %v417_v62  ;;  %v436_v1 = vsel %vm422_vm6, nan, %v435_v60  ;;  %v195_v2 = vmul.f32 %v384_v34, %v630_v11  ;;  %vm388_vm3 = vcmp.eq.f32.partialorder %v579_v35, inf }
  0xe7   :  { %v419_v36 = vsel %vm403_vm1, 0.0, %v418_v0  ;;  %v402_v33 = vsel %vm388_vm3, inf, %v401_v63  ;;  %vm421_vm5 = vcmp.eq.f32.partialorder %v585_v39, 0.0  ;;  %vm424_vm7 = vcmp.eq.f32.partialorder %v591_v42, inf }
  0xe8   :  { %v420_v3 = vsel %vm406_vm2, inf, %v419_v36  ;;  %v437_v5 = vsel %vm421_vm5, 0.0, %v436_v1  ;;  %v196_v40 = vmul.f32 %v402_v33, %v630_v11  ;;  %v231_v7 = vlaneseq }
  0xe9   :  { %v197_v4 = vmul.f32 %v420_v3, %v630_v11  ;;  %v438_v6 = vsel %vm424_vm7, inf, %v437_v5  ;;  %vm265_vm9 = vcmask 1041409   ;;  %vm267_vm10 = vcmask 1042434  }
  0xea   :  { %220 = vperm.xlu1 %444, %v195_v2   ;;  %v198_v45 = vmul.f32 %v438_v6, %v630_v11  ;;  %v232_v8 = vand.u32 127, %v231_v7  ;;  %v234_v9 = vshrl.u32 %v231_v7, 7  ;;  %vm269_vm11 = vcmask 1043459  }
  0xeb   :  { %226 = vperm.xlu0 %445, %v197_v4   ;;  %vm271_vm8 = vcmask 1044484   ;;  %vm273_vm12 = vcmask 1045509   ;;  %vm275_vm13 = vcmask 1046534   ;;  %vm277_vm14 = vcmask 1047559  }
  0xec   :  { %v235_v39 = vsub.s32 %v232_v8, %v234_v9  ;;  %vm280_vm0 = vcmask 31744   ;;  %v285_v46 = vstv %s718_s2  ;;  %vm287_vm15 = vcmask 7168  }
  0xee   :  { %223 = vperm.xlu1 %444, %v196_v40  }
  0xf2   :  { %229 = vperm.xlu1 %444, %v198_v45  }
 0x15c   :  { %v209_v35 = vpop.permute.xlu1 %208 }
 0x15d   :  { %v236_v15 = vrot.slane %v209_v35, %v235_v39 }
 0x15f   :  { %v218_v16 = vpop.permute.xlu0 %217 }
 0x160   :  { %v248_v11 = vrot.slane %v218_v16, %v235_v39 }
 0x161   :  { %v212_v10 = vpop.permute.xlu1 %211 }
 0x162   :  { %v240_v13 = vrot.slane %v212_v10, %v235_v39 }
 0x164   :  { %v266_v42 = vsel %vm265_vm9, %v240_v13, %v236_v15 }
 0x165   :  { %v215_v12 = vpop.permute.xlu1 %214 }
 0x166   :  { %v244_v14 = vrot.slane %v215_v12, %v235_v39 }
 0x168   :  { %v268_v18 = vsel %vm267_vm10, %v244_v14, %v266_v42 }
 0x169   :  { %v221_v17 = vpop.permute.xlu1 %220  ;;  %v270_v25 = vsel %vm269_vm11, %v248_v11, %v268_v18 }
 0x16a   :  { %v252_v19 = vrot.slane %v221_v17, %v235_v39  ;;  %v227_v22 = vpop.permute.xlu0 %226 }
 0x16b   :  { %v260_v32 = vrot.slane %v227_v22, %v235_v39 }
 0x16c   :  { %v272_v31 = vsel %vm271_vm8, %v252_v19, %v270_v25 }
 0x16d   :  { %v224_v20 = vpop.permute.xlu1 %223 }
 0x16e   :  { %v256_v26 = vrot.slane %v224_v20, %v235_v39 }
 0x170   :  { %v274_v24 = vsel %vm273_vm12, %v256_v26, %v272_v31 }
 0x171   :  { %v230_v37 = vpop.permute.xlu1 %229  ;;  %v276_v41 = vsel %vm275_vm13, %v260_v32, %v274_v24 }
 0x172   :  { %v264_v38 = vrot.slane %v230_v37, %v235_v39 }
 0x174   :  { %v278_v43 = vsel %vm277_vm14, %v264_v38, %v276_v41 }
 0x175   :  { %v281_v44 = vsel %vm280_vm0, %v278_v43, 0.0 }
 0x176   :  { %282 = vadd.xlane.f32.xlu0 %v281_v44 }
 0x203   :  { %v283_v47 = vpop.xlane.xlu0 %282 }
 0x204   :  { %v286_v27 = vadd.f32 %v285_v46, %v283_v47 }
 0x206   :  { %288 = vst.msk [vmem:[%s719_s3] sm:$0xff] %vm287_vm15, %v286_v27 }
 0x207   :  { %293 = vsyncpa [#allocation5], 1 }

</bundles_post_ra>
